<compile_context>
chip_gen: v7x
topology: tpu7x:2x2x1
jax: 0.10.0
libtpu: 0.0.40
codegen_flags: <defaults>
</compile_context>

<pallas_src>
import jax
import jax.numpy as jnp
from jax.experimental import pallas as pl
from jax.experimental.pallas import tpu as pltpu


def _binarize_kernel(x_ref, o_ref):
    # sign binarization: +1 for x >= 0, -1 otherwise (elementwise, VPU).
    x = x_ref[...]
    o_ref[...] = jnp.where(x >= 0, 1.0, -1.0).astype(o_ref.dtype)


_LANES = 1024                   # wide, lane-dense slab (multiple of 128)
_TARGET_BLOCK_BYTES = 2 << 20   # ~2 MiB blocks: in+out double-buffered ~8 MiB,
                                # fits v5e's 16 MiB scoped VMEM with headroom.


def _round_up(a: int, b: int) -> int:
    return ((a + b - 1) // b) * b


def binarize(x: jnp.ndarray) -> jnp.ndarray:
    """Sign-binarize a tensor (any shape, e.g. NCHW) with a Pallas TPU kernel."""
    orig_shape = x.shape
    orig_dtype = x.dtype
    total = x.size
    itemsize = jnp.dtype(orig_dtype).itemsize

    # dtype-aware minimum sublane count: 8 for 32-bit, 16 for bf16, 32 for int8
    sublane_min = max(8, 32 // itemsize)

    lanes = _LANES
    rows_needed = pl.cdiv(total, lanes)

    # Target a multi-MiB block, rounded to sublane granularity.
    target_rows = max(sublane_min, _TARGET_BLOCK_BYTES // (lanes * itemsize))
    target_rows = _round_up(target_rows, sublane_min)

    tile_rows = min(target_rows, _round_up(rows_needed, sublane_min))
    tile_rows = _round_up(tile_rows, sublane_min)

    # Pad row count UP to tile granularity (never shrink the tile).
    rows = _round_up(rows_needed, tile_rows)
    padded = rows * lanes

    x_flat = jnp.ravel(x)
    if padded != total:
        x_flat = jnp.pad(x_flat, (0, padded - total))
    x2d = x_flat.reshape(rows, lanes)

    grid = (rows // tile_rows,)

    out2d = pl.pallas_call(
        _binarize_kernel,
        out_shape=jax.ShapeDtypeStruct((rows, lanes), orig_dtype),
        grid_spec=pltpu.PrefetchScalarGridSpec(
            num_scalar_prefetch=0,
            grid=grid,
            in_specs=[pl.BlockSpec((tile_rows, lanes), lambda i: (i, 0))],
            out_specs=pl.BlockSpec((tile_rows, lanes), lambda i: (i, 0)),
        ),
        compiler_params=pltpu.CompilerParams(
            # "parallel" lets v7x shard the grid across its 2 TensorCores.
            dimension_semantics=("parallel",),
            # Explicit scoped-VMEM cap: 4 x 2 MiB buffers + headroom; safe on
            # v5e (16 MiB default would also fit) and within v7x's 64 MiB.
            vmem_limit_bytes=32 * 1024 * 1024,
        ),
    )(x2d)

    if padded != total:
        out_flat = out2d.reshape(-1)[:total]
        return out_flat.reshape(orig_shape)
    return out2d.reshape(orig_shape)


if __name__ == "__main__":
    key = jax.random.PRNGKey(0)
    # NCHW input, matching PyTorch conv-style activations.
    x = jax.random.normal(key, (2, 4, 16, 16), dtype=jnp.float32)

    y = binarize(x)
    y = jax.block_until_ready(y)

    # sanity check against plain-JAX reference
    ref = jnp.where(x >= 0, 1.0, -1.0).astype(x.dtype)
    assert y.shape == x.shape and y.dtype == x.dtype
    assert bool(jnp.all(y == ref))
    print("KERNEL_OK")
</pallas_src>

<mosaic_0001>
module attributes {stable_mosaic.version = 11 : i64} {
  func.func @_binarize_kernel(%arg0: i32, %arg1: memref<8x1024xf32, #tpu.memory_space<vmem>>, %arg2: memref<8x1024xf32, #tpu.memory_space<vmem>>) attributes {dimension_semantics = [#tpu.dimension_semantics<parallel>], iteration_bounds = array<i64: 1>, scalar_prefetch = 0 : i64, scratch_operands = 0 : i64, tpu.core_type = #tpu.core_type<tc>, window_params = [{transform_indices = @transform_0, window_bounds = array<i64: 8, 1024>}, {transform_indices = @transform_1, window_bounds = array<i64: 8, 1024>}]} {
    %c0 = arith.constant 0 : index
    %c0_0 = arith.constant 0 : index
    %0 = vector.load %arg1[%c0, %c0_0] : memref<8x1024xf32, #tpu.memory_space<vmem>>, vector<8x1024xf32>
    %cst = arith.constant 0.000000e+00 : f32
    %1 = vector.broadcast %cst : f32 to vector<8x1024xf32>
    %2 = arith.cmpf oge, %0, %1 : vector<8x1024xf32>
    %cst_1 = arith.constant 1.000000e+00 : f32
    %cst_2 = arith.constant -1.000000e+00 : f32
    %3 = vector.broadcast %cst_1 : f32 to vector<8x1024xf32>
    %4 = vector.broadcast %cst_2 : f32 to vector<8x1024xf32>
    %5 = arith.select %2, %3, %4 : vector<8x1024xi1>, vector<8x1024xf32>
    %c0_3 = arith.constant 0 : index
    %c0_4 = arith.constant 0 : index
    %6 = vector.load %arg2[%c0_3, %c0_4] : memref<8x1024xf32, #tpu.memory_space<vmem>>, vector<8x1024xf32>
    tpu.vector_store %arg2[%c0_3, %c0_4], %5 {strides = array<i32>} : memref<8x1024xf32, #tpu.memory_space<vmem>>, vector<8x1024xf32>,
    return
  }
  func.func @transform_0(%arg0: i32) -> (i32, i32) {
    %c0_i32 = arith.constant 0 : i32
    %c0_i32_0 = arith.constant 0 : i32
    return %arg0, %c0_i32 : i32, i32
  }
  func.func @transform_1(%arg0: i32) -> (i32, i32) {
    %c0_i32 = arith.constant 0 : i32
    %c0_i32_0 = arith.constant 0 : i32
    return %arg0, %c0_i32 : i32, i32
  }
}

</mosaic_0001>

<bundles_post_ra>
// kernel: tpu_custom_call.1
= control target key start
LH: loop header
LB: loop body
LE: loop exit
PB: predicated region body
PF: predicated region fallthrough
CT: control target
= control target key end

     0   :  { %6 = vsyncpa [#allocation3], 0  ;;  %s156_s0 = inlined_call_operand.hbm [shape: f32[8,1024], index: 0, kind: input, shape index: {}]   ;;  %s157_s1 = inlined_call_operand.hbm [shape: f32[8,1024], index: 1, kind: output, shape index: {}]  }
   0x1   :  { %7 = vsyncpa [#allocation4], 0  ;;  %s119_s6 = smov [#allocation2]   ;;  %s71_s10 = scalar_lea.hbm %s156_s0, 1024 }
   0x2   :  { %s14_s7 = sshll.u32 %s119_s6, 4  ;;  %p72_p0 = scmp.ne.s32.totalorder %s156_s0, %s71_s10  ;;  %s15_s7 = int_to_ptr.vmem [resolvable:$true] %s14_s7 }
   0x3   :  { %p75_p1 = scmp.lt.u32.totalorder %s71_s10, %s156_s0 }
   0x5   :  { %p77_p2 = pnand %p75_p1, %p72_p0 }
   0x7   :  { %80 = shalt.err (!%p77_p2)
}
   0x8   :  { %s81_s15 = scalar_lea.vmem %s15_s7, 1024  ;;  %p86_p4 = scmp.lt.s32.totalorder %s15_s7, %s15_s7 }
   0x9   :  { %p82_p3 = scmp.ne.s32.totalorder %s15_s7, %s81_s15  ;;  %p87_p5 = scmp.lt.s32.totalorder %s81_s15, %s81_s15 }
   0xb   :  { %p88_p6 = por %p87_p5, %p86_p4 }
   0xd   :  { %p89_p7 = pnand %p88_p6, %p82_p3 }
   0xf   :  { %92 = shalt.err (!%p89_p7)
}
  0x10   :  { %17 = dma.hbm_to_vmem [thread:$0]  %s156_s0, 1024, %s15_s7, [#allocation3]  }
  0x11   :  { %115 = dma.done.wait [#allocation3], 1024  }
  0x12   :  { %116 = vsyncadd [#allocation3], 4294966272  ;;  %v21_v0 = vld [vmem:[#allocation2] sm:$0xff]  ;;  %v22_v1 = vld [vmem:[#allocation2 + $0x8] sm:$0xff]  ;;  %s120_s18 = smov [#allocation5]   ;;  %v121_v6 = vmov -1.0  }
  0x13   :  { %v23_v2 = vld [vmem:[#allocation2 + $0x10] sm:$0xff]  ;;  %s59_s19 = sshll.u32 %s120_s18, 4  ;;  %vm29_vm0 = vcmp.ge.f32.partialorder %v21_v0, 0.0  ;;  %vm30_vm1 = vcmp.ge.f32.partialorder %v22_v1, 0.0  ;;  %v24_v3 = vld [vmem:[#allocation2 + $0x18] sm:$0xff]  ;;  %v25_v4 = vld [vmem:[#allocation2 + $0x20] sm:$0xff]  ;;  %s60_s19 = int_to_ptr.vmem [resolvable:$true] %s59_s19 }
  0x14   :  { %vm31_vm2 = vcmp.ge.f32.partialorder %v23_v2, 0.0  ;;  %v26_v5 = vld [vmem:[#allocation2 + $0x28] sm:$0xff]  ;;  %v37_v7 = vsel %vm29_vm0, 1.0, %v121_v6  ;;  %v38_v8 = vsel %vm30_vm1, 1.0, %v121_v6  ;;  %vm32_vm3 = vcmp.ge.f32.partialorder %v24_v3, 0.0  ;;  %v27_v10 = vld [vmem:[#allocation2 + $0x30] sm:$0xff]  ;;  %p98_p9 = scmp.lt.s32.totalorder %s60_s19, %s60_s19 }
  0x15   :  { %v39_v9 = vsel %vm31_vm2, 1.0, %v121_v6  ;;  %v28_v11 = vld [vmem:[#allocation2 + $0x38] sm:$0xff]  ;;  %45 = vst [vmem:[#allocation5] sm:$0xff] %v37_v7  ;;  %46 = vst [vmem:[#allocation5 + $0x8] sm:$0xff] %v38_v8  ;;  %v40_v12 = vsel %vm32_vm3, 1.0, %v121_v6  ;;  %vm33_vm4 = vcmp.ge.f32.partialorder %v25_v4, 0.0 }
  0x16   :  { %47 = vst [vmem:[#allocation5 + $0x10] sm:$0xff] %v39_v9  ;;  %vm34_vm5 = vcmp.ge.f32.partialorder %v26_v5, 0.0  ;;  %vm35_vm6 = vcmp.ge.f32.partialorder %v27_v10, 0.0  ;;  %48 = vst [vmem:[#allocation5 + $0x18] sm:$0xff] %v40_v12  ;;  %v41_v13 = vsel %vm33_vm4, 1.0, %v121_v6  ;;  %vm36_vm7 = vcmp.ge.f32.partialorder %v28_v11, 0.0 }
  0x17   :  { %v42_v14 = vsel %vm34_vm5, 1.0, %v121_v6  ;;  %v43_v15 = vsel %vm35_vm6, 1.0, %v121_v6  ;;  %49 = vst [vmem:[#allocation5 + $0x20] sm:$0xff] %v41_v13  ;;  %v44_v16 = vsel %vm36_vm7, 1.0, %v121_v6  ;;  %s93_s0 = scalar_lea.vmem %s60_s19, 1024 }
  0x18   :  { %50 = vst [vmem:[#allocation5 + $0x28] sm:$0xff] %v42_v14  ;;  %51 = vst [vmem:[#allocation5 + $0x30] sm:$0xff] %v43_v15  ;;  %p94_p8 = scmp.ne.s32.totalorder %s60_s19, %s93_s0  ;;  %p99_p10 = scmp.lt.s32.totalorder %s93_s0, %s93_s0 }
  0x19   :  { %52 = vst [vmem:[#allocation5 + $0x38] sm:$0xff] %v44_v16 }
  0x1a   :  { %p100_p11 = por %p99_p10, %p98_p9 }
  0x1c   :  { %p101_p12 = pnand %p100_p11, %p94_p8 }
  0x1e   :  { %104 = shalt.err (!%p101_p12)
}
  0x1f   :  { %s105_s22 = scalar_lea.hbm %s157_s1, 1024 }
  0x20   :  { %p106_p13 = scmp.ne.s32.totalorder %s157_s1, %s105_s22  ;;  %p109_p0 = scmp.lt.u32.totalorder %s105_s22, %s157_s1 }
  0x22   :  { %p111_p1 = pnand %p109_p0, %p106_p13 }
  0x24   :  { %114 = shalt.err (!%p111_p1)
}
  0x25   :  { %62 = dma.vmem_to_hbm [thread:$0]  %s60_s19, 1024, %s157_s1, [#allocation4]  }
  0x26   :  { %117 = dma.done.wait [#allocation4], 1024  }
  0x27   :  { %118 = vsyncadd [#allocation4], 4294966272 }
  0x28   :  { %66 = vsyncpa [#allocation3], 1 }
  0x29   :  { %67 = vsyncpa [#allocation4], 1 }

</bundles_post_ra>
